<compile_context>
chip_gen: v6e
topology: v6e:2x2x1
jax: 0.10.0
libtpu: 0.0.40
codegen_flags: <defaults>
</compile_context>

<pallas_src>
import functools
import math

import jax
import jax.numpy as jnp
from jax import lax
from jax.experimental import pallas as pl
from jax.experimental.pallas import tpu as pltpu

# Loss weights from GraphMatchingLoss.__init__ (no learnable parameters).
POSITIVE_WEIGHT = 1.0
NEGATIVE_WEIGHT = 1.0
GEOMETRIC_WEIGHT = 0.1

_LANES = 128
_MAX_TILE_ROWS = 2048   # rows per grid step; VMEM-safe on v5e/v6e/v7x
_N_CORE_SPLIT = 2       # leading "parallel" grid axis -> both TensorCores on v7x


def _view_2d(arr):
    """Zero-copy 2-D view of `arr` for the kernel.

    Lane-dense [size/128, 128] when the total element count divides 128
    (free reshape of a contiguous array), otherwise collapse all leading
    dims so the last dim maps to lanes.  Returns (view, rows, lane_width).
    """
    size = int(math.prod(arr.shape))
    if size % _LANES == 0:
        lw = _LANES
    else:
        lw = int(arr.shape[-1])
    rows = size // lw
    return arr.reshape(rows, lw), rows, lw


def _pick_tile_rows(rows):
    """Row-tile size: multiple of 32 (int8-safe) and never larger than rows."""
    if rows < 32:
        return rows                                   # block == full dim (always legal)
    return min(_MAX_TILE_ROWS, (rows // 32) * 32)


def _loss_kernel(pa_ref, ta_ref, pm_ref, tm_ref, oa_ref, om_ref, *,
                 tiles_per_core,
                 tile_rows_a, lw_a, rows_a, sub_a,
                 tile_rows_m, lw_m, rows_m, sub_m):
    c = pl.program_id(0)          # core-split ("parallel") axis
    t = pl.program_id(1)          # tile ("arbitrary") axis

    # Per-core output blocks are resident across the inner axis -> accumulators.
    @pl.when(t == 0)
    def _init():
        oa_ref[...] = jnp.zeros_like(oa_ref)
        om_ref[...] = jnp.zeros_like(om_ref)

    gtile = c * tiles_per_core + t
    row0_a = gtile * tile_rows_a
    row0_m = gtile * tile_rows_m

    def fold(x, sub, lw):
        # vreg-shaped partial sum: plain vector adds over the leading dim,
        # defer the final 8->1 / cross-lane reduce to the wrapper.
        if sub == 1:
            return jnp.sum(x, axis=0, keepdims=True)
        return jnp.sum(x.reshape(-1, sub, lw), axis=0)

    def accumulate(masked):
        # ---- assignment branch: stable BCE-with-logits ----
        x = pa_ref[...].astype(jnp.float32)
        z = ta_ref[...].astype(jnp.float32)
        bce = jnp.maximum(x, 0.0) - x * z + jnp.log1p(jnp.exp(-jnp.abs(x)))

        # ---- matching branch ----
        p = pm_ref[...].astype(jnp.float32)
        g = tm_ref[...].astype(jnp.float32)
        pos = g > 0.0
        neg = g == 0.0

        if masked:  # only edge tiles pay for the padding masks
            ra = row0_a + lax.broadcasted_iota(jnp.int32, (tile_rows_a, lw_a), 0)
            rm = row0_m + lax.broadcasted_iota(jnp.int32, (tile_rows_m, lw_m), 0)
            bce = jnp.where(ra < rows_a, bce, 0.0)
            vm = rm < rows_m
            pos = jnp.logical_and(pos, vm)
            neg = jnp.logical_and(neg, vm)

        # Single log per element: select its argument first.
        lg = jnp.log(jnp.where(pos, p + 1e-8, 1.0 - p + 1e-8))
        pos_l = jnp.where(pos, lg, 0.0)
        neg_l = jnp.where(neg, lg, 0.0)
        cnt = jnp.where(pos, 1.0, 0.0)

        oa_ref[0] += fold(bce, sub_a, lw_a)
        om_ref[0, 0] += fold(pos_l, sub_m, lw_m)
        om_ref[0, 1] += fold(neg_l, sub_m, lw_m)
        om_ref[0, 2] += fold(cnt, sub_m, lw_m)

    interior = jnp.logical_and(row0_a + tile_rows_a <= rows_a,
                               row0_m + tile_rows_m <= rows_m)

    @pl.when(interior)
    def _full_tile():
        accumulate(False)

    @pl.when(jnp.logical_not(interior))
    def _edge_tile():
        accumulate(True)


def graph_matching_loss(predictions, targets,
                        positive_weight=POSITIVE_WEIGHT,
                        negative_weight=NEGATIVE_WEIGHT,
                        geometric_weight=GEOMETRIC_WEIGHT):
    """Pallas implementation of GraphMatchingLoss.forward (all three branches)."""
    ap = predictions['assignment_matrix']
    mp = predictions['matching_probs']
    ag = targets['gt_assignment']
    gm = targets['gt_matches']
    pt = predictions['transformation']
    gtt = targets['gt_transformation']

    ap2, rows_a, lw_a = _view_2d(ap)
    ag2, _, _ = _view_2d(ag)
    mp2, rows_m, lw_m = _view_2d(mp)
    gm2, _, _ = _view_2d(gm)

    n_assign = rows_a * lw_a
    n_match = rows_m * lw_m

    tile_rows_a = _pick_tile_rows(rows_a)
    tile_rows_m = _pick_tile_rows(rows_m)
    sub_a = 8 if tile_rows_a % 8 == 0 else 1
    sub_m = 8 if tile_rows_m % 8 == 0 else 1

    tiles_a = -(-rows_a // tile_rows_a)
    tiles_m = -(-rows_m // tile_rows_m)
    tiles = max(tiles_a, tiles_m)
    n_split = max(1, min(_N_CORE_SPLIT, tiles))
    tiles_per_core = -(-tiles // n_split)

    def idx_a(c, t):
        return (jnp.minimum(c * tiles_per_core + t, tiles_a - 1), 0)

    def idx_m(c, t):
        return (jnp.minimum(c * tiles_per_core + t, tiles_m - 1), 0)

    kernel = functools.partial(
        _loss_kernel,
        tiles_per_core=tiles_per_core,
        tile_rows_a=tile_rows_a, lw_a=lw_a, rows_a=rows_a, sub_a=sub_a,
        tile_rows_m=tile_rows_m, lw_m=lw_m, rows_m=rows_m, sub_m=sub_m,
    )

    oa, om = pl.pallas_call(
        kernel,
        out_shape=(
            jax.ShapeDtypeStruct((n_split, sub_a, lw_a), jnp.float32),      # bce partials
            jax.ShapeDtypeStruct((n_split, 3, sub_m, lw_m), jnp.float32),   # pos/neg/cnt partials
        ),
        grid_spec=pltpu.PrefetchScalarGridSpec(
            num_scalar_prefetch=0,
            grid=(n_split, tiles_per_core),
            in_specs=[
                pl.BlockSpec((tile_rows_a, lw_a), idx_a),
                pl.BlockSpec((tile_rows_a, lw_a), idx_a),
                pl.BlockSpec((tile_rows_m, lw_m), idx_m),
                pl.BlockSpec((tile_rows_m, lw_m), idx_m),
            ],
            out_specs=[
                pl.BlockSpec((1, sub_a, lw_a), lambda c, t: (c, 0, 0)),
                pl.BlockSpec((1, 3, sub_m, lw_m), lambda c, t: (c, 0, 0, 0)),
            ],
        ),
        compiler_params=pltpu.CompilerParams(
            dimension_semantics=("parallel", "arbitrary"),
            vmem_limit_bytes=32 * 1024 * 1024,
        ),
    )(ap2, ag2, mp2, gm2)

    # Tiny final reductions / divides (a few hundred floats) in plain JAX.
    bce_sum = jnp.sum(oa)
    pos_sum = jnp.sum(om[:, 0])
    neg_sum = jnp.sum(om[:, 1])
    pos_cnt = jnp.sum(om[:, 2])

    assignment = bce_sum / float(n_assign)
    neg_cnt = float(n_match) - pos_cnt            # assumes gt_matches >= 0
    pos_loss = -pos_sum / jnp.maximum(pos_cnt, 1.0)   # guard empty class
    neg_loss = -neg_sum / jnp.maximum(neg_cnt, 1.0)
    matching = float(positive_weight) * pos_loss + float(negative_weight) * neg_loss

    # Geometric branch: 18 floats per batch element -> plain JAX (per perf review).
    d = pt.astype(jnp.float32) - gtt.astype(jnp.float32)
    geometric = float(geometric_weight) * jnp.mean(d * d)

    total = assignment + matching + geometric
    return {'assignment': assignment, 'matching': matching,
            'geometric': geometric, 'total': total}


def _reference(predictions, targets,
               positive_weight=POSITIVE_WEIGHT,
               negative_weight=NEGATIVE_WEIGHT,
               geometric_weight=GEOMETRIC_WEIGHT):
    """Pure-JAX reference mirroring the PyTorch semantics (for verification)."""
    x = predictions['assignment_matrix'].astype(jnp.float32)
    z = targets['gt_assignment'].astype(jnp.float32)
    assignment = jnp.mean(jnp.maximum(x, 0.0) - x * z + jnp.log1p(jnp.exp(-jnp.abs(x))))

    p = predictions['matching_probs'].astype(jnp.float32)
    g = targets['gt_matches'].astype(jnp.float32)
    pos_mask = (g > 0.0)
    neg_mask = (g == 0.0)
    pos_loss = -jnp.sum(jnp.where(pos_mask, jnp.log(p + 1e-8), 0.0)) / jnp.sum(pos_mask)
    neg_loss = -jnp.sum(jnp.where(neg_mask, jnp.log(1.0 - p + 1e-8), 0.0)) / jnp.sum(neg_mask)
    matching = positive_weight * pos_loss + negative_weight * neg_loss

    d = predictions['transformation'].astype(jnp.float32) - targets['gt_transformation'].astype(jnp.float32)
    geometric = geometric_weight * jnp.mean(d * d)

    total = assignment + matching + geometric
    return {'assignment': assignment, 'matching': matching,
            'geometric': geometric, 'total': total}


def _make_inputs(key, B, N, M):
    k1, k2, k3, k4, k5, k6 = jax.random.split(key, 6)
    assignment_pred = jax.random.normal(k1, (B, N, M), dtype=jnp.float32)              # logits
    gt_assignment = (jax.random.uniform(k2, (B, N, M)) > 0.5).astype(jnp.int8)         # 0/1 int8
    matching_probs = jax.nn.sigmoid(jax.random.normal(k3, (B, N, M), dtype=jnp.float32))
    gt_matches = (jax.random.uniform(k4, (B, N, M)) > 0.7).astype(jnp.int8)            # 0/1 int8
    pred_transform = jax.random.normal(k5, (B, 3, 3), dtype=jnp.float32)
    gt_transform = jax.random.normal(k6, (B, 3, 3), dtype=jnp.float32)
    predictions = {'assignment_matrix': assignment_pred,
                   'matching_probs': matching_probs,
                   'transformation': pred_transform}
    targets = {'gt_assignment': gt_assignment,
               'gt_matches': gt_matches,
               'gt_transformation': gt_transform}
    return predictions, targets


if __name__ == "__main__":
    key = jax.random.PRNGKey(0)
    ka, kb = jax.random.split(key, 2)

    # Case 1: lane-dense path (total elements divisible by 128), single tile.
    # Case 2: ragged path (last-dim lanes, grid-edge tile, two-way core split).
    for case_key, (B, N, M) in ((ka, (2, 16, 16)), (kb, (2, 33, 32))):
        predictions, targets = _make_inputs(case_key, B, N, M)

        losses = graph_matching_loss(predictions, targets)
        losses = jax.block_until_ready(losses)

        ref = _reference(predictions, targets)
        for k in ('assignment', 'matching', 'geometric', 'total'):
            assert jnp.allclose(losses[k], ref[k], rtol=1e-3, atol=1e-4), (
                f"mismatch in {k} at shape {(B, N, M)}: {losses[k]} vs {ref[k]}")

    print("KERNEL_OK")
</pallas_src>

<mosaic_0001>
module attributes {stable_mosaic.version = 11 : i64} {
  func.func @_loss_kernel(%arg0: i32, %arg1: i32, %arg2: memref<4x128xf32, #tpu.memory_space<vmem>>, %arg3: memref<4x128xi8, #tpu.memory_space<vmem>>, %arg4: memref<4x128xf32, #tpu.memory_space<vmem>>, %arg5: memref<4x128xi8, #tpu.memory_space<vmem>>, %arg6: memref<1x1x128xf32, #tpu.memory_space<vmem>>, %arg7: memref<1x3x1x128xf32, #tpu.memory_space<vmem>>) attributes {dimension_semantics = [#tpu.dimension_semantics<parallel>, #tpu.dimension_semantics<arbitrary>], iteration_bounds = array<i64: 1, 1>, scalar_prefetch = 0 : i64, scratch_operands = 0 : i64, tpu.core_type = #tpu.core_type<tc>, window_params = [{transform_indices = @transform_0, window_bounds = array<i64: 4, 128>}, {transform_indices = @transform_1, window_bounds = array<i64: 4, 128>}, {transform_indices = @transform_2, window_bounds = array<i64: 4, 128>}, {transform_indices = @transform_3, window_bounds = array<i64: 4, 128>}, {transform_indices = @transform_4, window_bounds = array<i64: 1, 1, 128>}, {transform_indices = @transform_5, window_bounds = array<i64: 1, 3, 1, 128>}]} {
    %c0_i32 = arith.constant 0 : i32
    %0 = arith.cmpi eq, %arg1, %c0_i32 : i32
    %1 = arith.extui %0 : i1 to i32
    %c0_i32_0 = arith.constant 0 : i32
    %2 = arith.cmpi ne, %1, %c0_i32_0 : i32
    scf.if %2 {
      %cst = arith.constant 0.000000e+00 : f32
      %17 = vector.broadcast %cst : f32 to vector<1x1x128xf32>
      %c0 = arith.constant 0 : index
      %c0_8 = arith.constant 0 : index
      %c0_9 = arith.constant 0 : index
      %18 = vector.load %arg6[%c0, %c0_8, %c0_9] : memref<1x1x128xf32, #tpu.memory_space<vmem>>, vector<1x1x128xf32>
      tpu.vector_store %arg6[%c0, %c0_8, %c0_9], %17 {strides = array<i32>} : memref<1x1x128xf32, #tpu.memory_space<vmem>>, vector<1x1x128xf32>,
      %cst_10 = arith.constant 0.000000e+00 : f32
      %19 = vector.broadcast %cst_10 : f32 to vector<1x3x1x128xf32>
      %c0_11 = arith.constant 0 : index
      %c0_12 = arith.constant 0 : index
      %c0_13 = arith.constant 0 : index
      %c0_14 = arith.constant 0 : index
      %20 = vector.load %arg7[%c0_11, %c0_12, %c0_13, %c0_14] : memref<1x3x1x128xf32, #tpu.memory_space<vmem>>, vector<1x3x1x128xf32>
      tpu.vector_store %arg7[%c0_11, %c0_12, %c0_13, %c0_14], %19 {strides = array<i32>} : memref<1x3x1x128xf32, #tpu.memory_space<vmem>>, vector<1x3x1x128xf32>,
    } else {
    }
    %c1_i32 = arith.constant 1 : i32
    %3 = arith.muli %arg0, %c1_i32 : i32
    %4 = arith.addi %3, %arg1 : i32
    %c4_i32 = arith.constant 4 : i32
    %5 = arith.muli %4, %c4_i32 : i32
    %c4_i32_1 = arith.constant 4 : i32
    %6 = arith.muli %4, %c4_i32_1 : i32
    %c4_i32_2 = arith.constant 4 : i32
    %7 = arith.addi %5, %c4_i32_2 : i32
    %c4_i32_3 = arith.constant 4 : i32
    %8 = arith.cmpi sle, %7, %c4_i32_3 : i32
    %c4_i32_4 = arith.constant 4 : i32
    %9 = arith.addi %6, %c4_i32_4 : i32
    %c4_i32_5 = arith.constant 4 : i32
    %10 = arith.cmpi sle, %9, %c4_i32_5 : i32
    %11 = arith.andi %8, %10 : i1
    %12 = arith.extui %11 : i1 to i32
    %c0_i32_6 = arith.constant 0 : i32
    %13 = arith.cmpi ne, %12, %c0_i32_6 : i32
    scf.if %13 {
      %c0 = arith.constant 0 : index
      %c0_8 = arith.constant 0 : index
      %17 = vector.load %arg2[%c0, %c0_8] : memref<4x128xf32, #tpu.memory_space<vmem>>, vector<4x128xf32>
      %c0_9 = arith.constant 0 : index
      %c0_10 = arith.constant 0 : index
      %18 = vector.load %arg3[%c0_9, %c0_10] : memref<4x128xi8, #tpu.memory_space<vmem>>, vector<4x128xi8>
      %19 = arith.sitofp %18 : vector<4x128xi8> to vector<4x128xf32>
      %cst = arith.constant 0.000000e+00 : f32
      %20 = vector.broadcast %cst : f32 to vector<4x128xf32>
      %21 = arith.maximumf %17, %20 : vector<4x128xf32>
      %22 = arith.mulf %17, %19 : vector<4x128xf32>
      %23 = arith.subf %21, %22 : vector<4x128xf32>
      %24 = math.absf %17 : vector<4x128xf32>
      %cst_11 = arith.constant 0.000000e+00 : f32
      %25 = vector.broadcast %cst_11 : f32 to vector<4x128xf32>
      %26 = arith.subf %25, %24 : vector<4x128xf32>
      %27 = math.exp %26 : vector<4x128xf32>
      %28 = math.log1p %27 : vector<4x128xf32>
      %29 = arith.addf %23, %28 : vector<4x128xf32>
      %c0_12 = arith.constant 0 : index
      %c0_13 = arith.constant 0 : index
      %30 = vector.load %arg4[%c0_12, %c0_13] : memref<4x128xf32, #tpu.memory_space<vmem>>, vector<4x128xf32>
      %c0_14 = arith.constant 0 : index
      %c0_15 = arith.constant 0 : index
      %31 = vector.load %arg5[%c0_14, %c0_15] : memref<4x128xi8, #tpu.memory_space<vmem>>, vector<4x128xi8>
      %32 = arith.sitofp %31 : vector<4x128xi8> to vector<4x128xf32>
      %cst_16 = arith.constant 0.000000e+00 : f32
      %33 = vector.broadcast %cst_16 : f32 to vector<4x128xf32>
      %34 = arith.cmpf ogt, %32, %33 : vector<4x128xf32>
      %cst_17 = arith.constant 0.000000e+00 : f32
      %35 = vector.broadcast %cst_17 : f32 to vector<4x128xf32>
      %36 = arith.cmpf oeq, %32, %35 : vector<4x128xf32>
      %cst_18 = arith.constant 9.99999993E-9 : f32
      %37 = vector.broadcast %cst_18 : f32 to vector<4x128xf32>
      %38 = arith.addf %30, %37 : vector<4x128xf32>
      %cst_19 = arith.constant 1.000000e+00 : f32
      %39 = vector.broadcast %cst_19 : f32 to vector<4x128xf32>
      %40 = arith.subf %39, %30 : vector<4x128xf32>
      %cst_20 = arith.constant 9.99999993E-9 : f32
      %41 = vector.broadcast %cst_20 : f32 to vector<4x128xf32>
      %42 = arith.addf %40, %41 : vector<4x128xf32>
      %43 = arith.select %34, %38, %42 : vector<4x128xi1>, vector<4x128xf32>
      %44 = math.log %43 : vector<4x128xf32>
      %cst_21 = arith.constant 0.000000e+00 : f32
      %45 = vector.broadcast %cst_21 : f32 to vector<4x128xf32>
      %46 = arith.select %34, %44, %45 : vector<4x128xi1>, vector<4x128xf32>
      %cst_22 = arith.constant 0.000000e+00 : f32
      %47 = vector.broadcast %cst_22 : f32 to vector<4x128xf32>
      %48 = arith.select %36, %44, %47 : vector<4x128xi1>, vector<4x128xf32>
      %cst_23 = arith.constant 1.000000e+00 : f32
      %cst_24 = arith.constant 0.000000e+00 : f32
      %49 = vector.broadcast %cst_23 : f32 to vector<4x128xf32>
      %50 = vector.broadcast %cst_24 : f32 to vector<4x128xf32>
      %51 = arith.select %34, %49, %50 : vector<4x128xi1>, vector<4x128xf32>
      %c0_25 = arith.constant 0 : index
      %c0_26 = arith.constant 0 : index
      %c0_27 = arith.constant 0 : index
      %52 = vector.load %arg6[%c0_25, %c0_26, %c0_27] : memref<1x1x128xf32, #tpu.memory_space<vmem>>, vector<1x1x128xf32>
      %53 = vector.shape_cast %52 : vector<1x1x128xf32> to vector<1x128xf32>
      %cst_28 = arith.constant dense<0.000000e+00> : vector<128xf32>
      %54 = vector.multi_reduction <add>, %29, %cst_28 [0] : vector<4x128xf32> to vector<128xf32>
      %55 = vector.shape_cast %54 : vector<128xf32> to vector<1x128xf32>
      %56 = arith.addf %53, %55 : vector<1x128xf32>
      %c0_29 = arith.constant 0 : index
      %c0_30 = arith.constant 0 : index
      %c0_31 = arith.constant 0 : index
      %57 = vector.load %arg6[%c0_29, %c0_30, %c0_31] : memref<1x1x128xf32, #tpu.memory_space<vmem>>, vector<1x1x128xf32>
      %58 = vector.shape_cast %57 : vector<1x1x128xf32> to vector<1x128xf32>
      %59 = vector.shape_cast %56 : vector<1x128xf32> to vector<1x1x128xf32>
      tpu.vector_store %arg6[%c0_29, %c0_30, %c0_31], %59 {strides = array<i32>} : memref<1x1x128xf32, #tpu.memory_space<vmem>>, vector<1x1x128xf32>,
      %c0_32 = arith.constant 0 : index
      %c0_33 = arith.constant 0 : index
      %c0_34 = arith.constant 0 : index
      %c0_35 = arith.constant 0 : index
      %60 = vector.load %arg7[%c0_32, %c0_33, %c0_34, %c0_35] : memref<1x3x1x128xf32, #tpu.memory_space<vmem>>, vector<1x1x1x128xf32>
      %61 = vector.shape_cast %60 : vector<1x1x1x128xf32> to vector<1x128xf32>
      %cst_36 = arith.constant dense<0.000000e+00> : vector<128xf32>
      %62 = vector.multi_reduction <add>, %46, %cst_36 [0] : vector<4x128xf32> to vector<128xf32>
      %63 = vector.shape_cast %62 : vector<128xf32> to vector<1x128xf32>
      %64 = arith.addf %61, %63 : vector<1x128xf32>
      %c0_37 = arith.constant 0 : index
      %c0_38 = arith.constant 0 : index
      %c0_39 = arith.constant 0 : index
      %c0_40 = arith.constant 0 : index
      %65 = vector.load %arg7[%c0_37, %c0_38, %c0_39, %c0_40] : memref<1x3x1x128xf32, #tpu.memory_space<vmem>>, vector<1x1x1x128xf32>
      %66 = vector.shape_cast %65 : vector<1x1x1x128xf32> to vector<1x128xf32>
      %67 = vector.shape_cast %64 : vector<1x128xf32> to vector<1x1x1x128xf32>
      tpu.vector_store %arg7[%c0_37, %c0_38, %c0_39, %c0_40], %67 {strides = array<i32>} : memref<1x3x1x128xf32, #tpu.memory_space<vmem>>, vector<1x1x1x128xf32>,
      %c0_41 = arith.constant 0 : index
      %c1 = arith.constant 1 : index
      %c0_42 = arith.constant 0 : index
      %c0_43 = arith.constant 0 : index
      %68 = vector.load %arg7[%c0_41, %c1, %c0_42, %c0_43] : memref<1x3x1x128xf32, #tpu.memory_space<vmem>>, vector<1x1x1x128xf32>
      %69 = vector.shape_cast %68 : vector<1x1x1x128xf32> to vector<1x128xf32>
      %cst_44 = arith.constant dense<0.000000e+00> : vector<128xf32>
      %70 = vector.multi_reduction <add>, %48, %cst_44 [0] : vector<4x128xf32> to vector<128xf32>
      %71 = vector.shape_cast %70 : vector<128xf32> to vector<1x128xf32>
      %72 = arith.addf %69, %71 : vector<1x128xf32>
      %c0_45 = arith.constant 0 : index
      %c1_46 = arith.constant 1 : index
      %c0_47 = arith.constant 0 : index
      %c0_48 = arith.constant 0 : index
      %73 = vector.load %arg7[%c0_45, %c1_46, %c0_47, %c0_48] : memref<1x3x1x128xf32, #tpu.memory_space<vmem>>, vector<1x1x1x128xf32>
      %74 = vector.shape_cast %73 : vector<1x1x1x128xf32> to vector<1x128xf32>
      %75 = vector.shape_cast %72 : vector<1x128xf32> to vector<1x1x1x128xf32>
      tpu.vector_store %arg7[%c0_45, %c1_46, %c0_47, %c0_48], %75 {strides = array<i32>} : memref<1x3x1x128xf32, #tpu.memory_space<vmem>>, vector<1x1x1x128xf32>,
      %c0_49 = arith.constant 0 : index
      %c2 = arith.constant 2 : index
      %c0_50 = arith.constant 0 : index
      %c0_51 = arith.constant 0 : index
      %76 = vector.load %arg7[%c0_49, %c2, %c0_50, %c0_51] : memref<1x3x1x128xf32, #tpu.memory_space<vmem>>, vector<1x1x1x128xf32>
      %77 = vector.shape_cast %76 : vector<1x1x1x128xf32> to vector<1x128xf32>
      %cst_52 = arith.constant dense<0.000000e+00> : vector<128xf32>
      %78 = vector.multi_reduction <add>, %51, %cst_52 [0] : vector<4x128xf32> to vector<128xf32>
      %79 = vector.shape_cast %78 : vector<128xf32> to vector<1x128xf32>
      %80 = arith.addf %77, %79 : vector<1x128xf32>
      %c0_53 = arith.constant 0 : index
      %c2_54 = arith.constant 2 : index
      %c0_55 = arith.constant 0 : index
      %c0_56 = arith.constant 0 : index
      %81 = vector.load %arg7[%c0_53, %c2_54, %c0_55, %c0_56] : memref<1x3x1x128xf32, #tpu.memory_space<vmem>>, vector<1x1x1x128xf32>
      %82 = vector.shape_cast %81 : vector<1x1x1x128xf32> to vector<1x128xf32>
      %83 = vector.shape_cast %80 : vector<1x128xf32> to vector<1x1x1x128xf32>
      tpu.vector_store %arg7[%c0_53, %c2_54, %c0_55, %c0_56], %83 {strides = array<i32>} : memref<1x3x1x128xf32, #tpu.memory_space<vmem>>, vector<1x1x1x128xf32>,
    } else {
    }
    %true = arith.constant true
    %14 = arith.xori %11, %true : i1
    %15 = arith.extui %14 : i1 to i32
    %c0_i32_7 = arith.constant 0 : i32
    %16 = arith.cmpi ne, %15, %c0_i32_7 : i32
    scf.if %16 {
      %c0 = arith.constant 0 : index
      %c0_8 = arith.constant 0 : index
      %17 = vector.load %arg2[%c0, %c0_8] : memref<4x128xf32, #tpu.memory_space<vmem>>, vector<4x128xf32>
      %c0_9 = arith.constant 0 : index
      %c0_10 = arith.constant 0 : index
      %18 = vector.load %arg3[%c0_9, %c0_10] : memref<4x128xi8, #tpu.memory_space<vmem>>, vector<4x128xi8>
      %19 = arith.sitofp %18 : vector<4x128xi8> to vector<4x128xf32>
      %cst = arith.constant 0.000000e+00 : f32
      %20 = vector.broadcast %cst : f32 to vector<4x128xf32>
      %21 = arith.maximumf %17, %20 : vector<4x128xf32>
      %22 = arith.mulf %17, %19 : vector<4x128xf32>
      %23 = arith.subf %21, %22 : vector<4x128xf32>
      %24 = math.absf %17 : vector<4x128xf32>
      %cst_11 = arith.constant 0.000000e+00 : f32
      %25 = vector.broadcast %cst_11 : f32 to vector<4x128xf32>
      %26 = arith.subf %25, %24 : vector<4x128xf32>
      %27 = math.exp %26 : vector<4x128xf32>
      %28 = math.log1p %27 : vector<4x128xf32>
      %29 = arith.addf %23, %28 : vector<4x128xf32>
      %c0_12 = arith.constant 0 : index
      %c0_13 = arith.constant 0 : index
      %30 = vector.load %arg4[%c0_12, %c0_13] : memref<4x128xf32, #tpu.memory_space<vmem>>, vector<4x128xf32>
      %c0_14 = arith.constant 0 : index
      %c0_15 = arith.constant 0 : index
      %31 = vector.load %arg5[%c0_14, %c0_15] : memref<4x128xi8, #tpu.memory_space<vmem>>, vector<4x128xi8>
      %32 = arith.sitofp %31 : vector<4x128xi8> to vector<4x128xf32>
      %cst_16 = arith.constant 0.000000e+00 : f32
      %33 = vector.broadcast %cst_16 : f32 to vector<4x128xf32>
      %34 = arith.cmpf ogt, %32, %33 : vector<4x128xf32>
      %cst_17 = arith.constant 0.000000e+00 : f32
      %35 = vector.broadcast %cst_17 : f32 to vector<4x128xf32>
      %36 = arith.cmpf oeq, %32, %35 : vector<4x128xf32>
      %37 = tpu.iota {dimensions = array<i32: 0>} : vector<4x128xi32>
      %38 = vector.broadcast %5 : i32 to vector<4x128xi32>
      %39 = arith.addi %38, %37 : vector<4x128xi32>
      %40 = tpu.iota {dimensions = array<i32: 0>} : vector<4x128xi32>
      %41 = vector.broadcast %6 : i32 to vector<4x128xi32>
      %42 = arith.addi %41, %40 : vector<4x128xi32>
      %c4_i32_18 = arith.constant 4 : i32
      %43 = vector.broadcast %c4_i32_18 : i32 to vector<4x128xi32>
      %44 = arith.cmpi slt, %39, %43 : vector<4x128xi32>
      %cst_19 = arith.constant 0.000000e+00 : f32
      %45 = vector.broadcast %cst_19 : f32 to vector<4x128xf32>
      %46 = arith.select %44, %29, %45 : vector<4x128xi1>, vector<4x128xf32>
      %c4_i32_20 = arith.constant 4 : i32
      %47 = vector.broadcast %c4_i32_20 : i32 to vector<4x128xi32>
      %48 = arith.cmpi slt, %42, %47 : vector<4x128xi32>
      %49 = arith.andi %34, %48 : vector<4x128xi1>
      %50 = arith.andi %36, %48 : vector<4x128xi1>
      %cst_21 = arith.constant 9.99999993E-9 : f32
      %51 = vector.broadcast %cst_21 : f32 to vector<4x128xf32>
      %52 = arith.addf %30, %51 : vector<4x128xf32>
      %cst_22 = arith.constant 1.000000e+00 : f32
      %53 = vector.broadcast %cst_22 : f32 to vector<4x128xf32>
      %54 = arith.subf %53, %30 : vector<4x128xf32>
      %cst_23 = arith.constant 9.99999993E-9 : f32
      %55 = vector.broadcast %cst_23 : f32 to vector<4x128xf32>
      %56 = arith.addf %54, %55 : vector<4x128xf32>
      %57 = arith.select %49, %52, %56 : vector<4x128xi1>, vector<4x128xf32>
      %58 = math.log %57 : vector<4x128xf32>
      %cst_24 = arith.constant 0.000000e+00 : f32
      %59 = vector.broadcast %cst_24 : f32 to vector<4x128xf32>
      %60 = arith.select %49, %58, %59 : vector<4x128xi1>, vector<4x128xf32>
      %cst_25 = arith.constant 0.000000e+00 : f32
      %61 = vector.broadcast %cst_25 : f32 to vector<4x128xf32>
      %62 = arith.select %50, %58, %61 : vector<4x128xi1>, vector<4x128xf32>
      %cst_26 = arith.constant 1.000000e+00 : f32
      %cst_27 = arith.constant 0.000000e+00 : f32
      %63 = vector.broadcast %cst_26 : f32 to vector<4x128xf32>
      %64 = vector.broadcast %cst_27 : f32 to vector<4x128xf32>
      %65 = arith.select %49, %63, %64 : vector<4x128xi1>, vector<4x128xf32>
      %c0_28 = arith.constant 0 : index
      %c0_29 = arith.constant 0 : index
      %c0_30 = arith.constant 0 : index
      %66 = vector.load %arg6[%c0_28, %c0_29, %c0_30] : memref<1x1x128xf32, #tpu.memory_space<vmem>>, vector<1x1x128xf32>
      %67 = vector.shape_cast %66 : vector<1x1x128xf32> to vector<1x128xf32>
      %cst_31 = arith.constant dense<0.000000e+00> : vector<128xf32>
      %68 = vector.multi_reduction <add>, %46, %cst_31 [0] : vector<4x128xf32> to vector<128xf32>
      %69 = vector.shape_cast %68 : vector<128xf32> to vector<1x128xf32>
      %70 = arith.addf %67, %69 : vector<1x128xf32>
      %c0_32 = arith.constant 0 : index
      %c0_33 = arith.constant 0 : index
      %c0_34 = arith.constant 0 : index
      %71 = vector.load %arg6[%c0_32, %c0_33, %c0_34] : memref<1x1x128xf32, #tpu.memory_space<vmem>>, vector<1x1x128xf32>
      %72 = vector.shape_cast %71 : vector<1x1x128xf32> to vector<1x128xf32>
      %73 = vector.shape_cast %70 : vector<1x128xf32> to vector<1x1x128xf32>
      tpu.vector_store %arg6[%c0_32, %c0_33, %c0_34], %73 {strides = array<i32>} : memref<1x1x128xf32, #tpu.memory_space<vmem>>, vector<1x1x128xf32>,
      %c0_35 = arith.constant 0 : index
      %c0_36 = arith.constant 0 : index
      %c0_37 = arith.constant 0 : index
      %c0_38 = arith.constant 0 : index
      %74 = vector.load %arg7[%c0_35, %c0_36, %c0_37, %c0_38] : memref<1x3x1x128xf32, #tpu.memory_space<vmem>>, vector<1x1x1x128xf32>
      %75 = vector.shape_cast %74 : vector<1x1x1x128xf32> to vector<1x128xf32>
      %cst_39 = arith.constant dense<0.000000e+00> : vector<128xf32>
      %76 = vector.multi_reduction <add>, %60, %cst_39 [0] : vector<4x128xf32> to vector<128xf32>
      %77 = vector.shape_cast %76 : vector<128xf32> to vector<1x128xf32>
      %78 = arith.addf %75, %77 : vector<1x128xf32>
      %c0_40 = arith.constant 0 : index
      %c0_41 = arith.constant 0 : index
      %c0_42 = arith.constant 0 : index
      %c0_43 = arith.constant 0 : index
      %79 = vector.load %arg7[%c0_40, %c0_41, %c0_42, %c0_43] : memref<1x3x1x128xf32, #tpu.memory_space<vmem>>, vector<1x1x1x128xf32>
      %80 = vector.shape_cast %79 : vector<1x1x1x128xf32> to vector<1x128xf32>
      %81 = vector.shape_cast %78 : vector<1x128xf32> to vector<1x1x1x128xf32>
      tpu.vector_store %arg7[%c0_40, %c0_41, %c0_42, %c0_43], %81 {strides = array<i32>} : memref<1x3x1x128xf32, #tpu.memory_space<vmem>>, vector<1x1x1x128xf32>,
      %c0_44 = arith.constant 0 : index
      %c1 = arith.constant 1 : index
      %c0_45 = arith.constant 0 : index
      %c0_46 = arith.constant 0 : index
      %82 = vector.load %arg7[%c0_44, %c1, %c0_45, %c0_46] : memref<1x3x1x128xf32, #tpu.memory_space<vmem>>, vector<1x1x1x128xf32>
      %83 = vector.shape_cast %82 : vector<1x1x1x128xf32> to vector<1x128xf32>
      %cst_47 = arith.constant dense<0.000000e+00> : vector<128xf32>
      %84 = vector.multi_reduction <add>, %62, %cst_47 [0] : vector<4x128xf32> to vector<128xf32>
      %85 = vector.shape_cast %84 : vector<128xf32> to vector<1x128xf32>
      %86 = arith.addf %83, %85 : vector<1x128xf32>
      %c0_48 = arith.constant 0 : index
      %c1_49 = arith.constant 1 : index
      %c0_50 = arith.constant 0 : index
      %c0_51 = arith.constant 0 : index
      %87 = vector.load %arg7[%c0_48, %c1_49, %c0_50, %c0_51] : memref<1x3x1x128xf32, #tpu.memory_space<vmem>>, vector<1x1x1x128xf32>
      %88 = vector.shape_cast %87 : vector<1x1x1x128xf32> to vector<1x128xf32>
      %89 = vector.shape_cast %86 : vector<1x128xf32> to vector<1x1x1x128xf32>
      tpu.vector_store %arg7[%c0_48, %c1_49, %c0_50, %c0_51], %89 {strides = array<i32>} : memref<1x3x1x128xf32, #tpu.memory_space<vmem>>, vector<1x1x1x128xf32>,
      %c0_52 = arith.constant 0 : index
      %c2 = arith.constant 2 : index
      %c0_53 = arith.constant 0 : index
      %c0_54 = arith.constant 0 : index
      %90 = vector.load %arg7[%c0_52, %c2, %c0_53, %c0_54] : memref<1x3x1x128xf32, #tpu.memory_space<vmem>>, vector<1x1x1x128xf32>
      %91 = vector.shape_cast %90 : vector<1x1x1x128xf32> to vector<1x128xf32>
      %cst_55 = arith.constant dense<0.000000e+00> : vector<128xf32>
      %92 = vector.multi_reduction <add>, %65, %cst_55 [0] : vector<4x128xf32> to vector<128xf32>
      %93 = vector.shape_cast %92 : vector<128xf32> to vector<1x128xf32>
      %94 = arith.addf %91, %93 : vector<1x128xf32>
      %c0_56 = arith.constant 0 : index
      %c2_57 = arith.constant 2 : index
      %c0_58 = arith.constant 0 : index
      %c0_59 = arith.constant 0 : index
      %95 = vector.load %arg7[%c0_56, %c2_57, %c0_58, %c0_59] : memref<1x3x1x128xf32, #tpu.memory_space<vmem>>, vector<1x1x1x128xf32>
      %96 = vector.shape_cast %95 : vector<1x1x1x128xf32> to vector<1x128xf32>
      %97 = vector.shape_cast %94 : vector<1x128xf32> to vector<1x1x1x128xf32>
      tpu.vector_store %arg7[%c0_56, %c2_57, %c0_58, %c0_59], %97 {strides = array<i32>} : memref<1x3x1x128xf32, #tpu.memory_space<vmem>>, vector<1x1x1x128xf32>,
    } else {
    }
    return
  }
  func.func @transform_0(%arg0: i32, %arg1: i32) -> (i32, i32) {
    %c1_i32 = arith.constant 1 : i32
    %0 = arith.muli %arg0, %c1_i32 : i32
    %1 = arith.addi %0, %arg1 : i32
    %c0_i32 = arith.constant 0 : i32
    %2 = arith.minsi %1, %c0_i32 : i32
    %c0_i32_0 = arith.constant 0 : i32
    %c0_i32_1 = arith.constant 0 : i32
    return %2, %c0_i32_0 : i32, i32
  }
  func.func @transform_1(%arg0: i32, %arg1: i32) -> (i32, i32) {
    %c1_i32 = arith.constant 1 : i32
    %0 = arith.muli %arg0, %c1_i32 : i32
    %1 = arith.addi %0, %arg1 : i32
    %c0_i32 = arith.constant 0 : i32
    %2 = arith.minsi %1, %c0_i32 : i32
    %c0_i32_0 = arith.constant 0 : i32
    %c0_i32_1 = arith.constant 0 : i32
    return %2, %c0_i32_0 : i32, i32
  }
  func.func @transform_2(%arg0: i32, %arg1: i32) -> (i32, i32) {
    %c1_i32 = arith.constant 1 : i32
    %0 = arith.muli %arg0, %c1_i32 : i32
    %1 = arith.addi %0, %arg1 : i32
    %c0_i32 = arith.constant 0 : i32
    %2 = arith.minsi %1, %c0_i32 : i32
    %c0_i32_0 = arith.constant 0 : i32
    %c0_i32_1 = arith.constant 0 : i32
    return %2, %c0_i32_0 : i32, i32
  }
  func.func @transform_3(%arg0: i32, %arg1: i32) -> (i32, i32) {
    %c1_i32 = arith.constant 1 : i32
    %0 = arith.muli %arg0, %c1_i32 : i32
    %1 = arith.addi %0, %arg1 : i32
    %c0_i32 = arith.constant 0 : i32
    %2 = arith.minsi %1, %c0_i32 : i32
    %c0_i32_0 = arith.constant 0 : i32
    %c0_i32_1 = arith.constant 0 : i32
    return %2, %c0_i32_0 : i32, i32
  }
  func.func @transform_4(%arg0: i32, %arg1: i32) -> (i32, i32, i32) {
    %c0_i32 = arith.constant 0 : i32
    %c0_i32_0 = arith.constant 0 : i32
    %c0_i32_1 = arith.constant 0 : i32
    return %arg0, %c0_i32, %c0_i32_0 : i32, i32, i32
  }
  func.func @transform_5(%arg0: i32, %arg1: i32) -> (i32, i32, i32, i32) {
    %c0_i32 = arith.constant 0 : i32
    %c0_i32_0 = arith.constant 0 : i32
    %c0_i32_1 = arith.constant 0 : i32
    %c0_i32_2 = arith.constant 0 : i32
    return %arg0, %c0_i32, %c0_i32_0, %c0_i32_1 : i32, i32, i32, i32
  }
}

</mosaic_0001>

<bundles_post_ra>
// kernel: tpu_custom_call.1
= control target key start
LH: loop header
LB: loop body
LE: loop exit
PB: predicated region body
PF: predicated region fallthrough
CT: control target
= control target key end

     0   :  { %11 = vsyncpa [#allocation3], 0  ;;  %s499_s0 = inlined_call_operand.hbm [shape: f32[4,128], index: 0, kind: input, shape index: {}]   ;;  %s500_s1 = inlined_call_operand.vmem [shape: s8[4,128], index: 1, kind: input, shape index: {}]   ;;  %s501_s2 = inlined_call_operand.hbm [shape: f32[4,128], index: 2, kind: input, shape index: {}]   ;;  %s502_s3 = inlined_call_operand.vmem [shape: s8[4,128], index: 3, kind: input, shape index: {}]   ;;  %s503_s4 = inlined_call_operand.hbm [shape: f32[1,1,128], index: 4, kind: output, shape index: {0}]   ;;  %s504_s5 = inlined_call_operand.hbm [shape: f32[1,3,1,128], index: 5, kind: output, shape index: {1}]  }
   0x1   :  { %12 = vsyncpa [#allocation6], 0 }
   0x2   :  { %13 = vsyncpa [#allocation4], 0 }
   0x3   :  { %14 = vsyncpa [#allocation9], 0  ;;  %s437_s18 = smov [#allocation2]   ;;  %s438_s20 = smov [#allocation5]  }
   0x4   :  { %s26_s19 = sshll.u32 %s437_s18, 4  ;;  %s52_s21 = sshll.u32 %s438_s20, 4  ;;  %s27_s19 = int_to_ptr.vmem [resolvable:$true] %s26_s19  ;;  %s53_s21 = int_to_ptr.vmem [resolvable:$true] %s52_s21 }
   0x5   :  { %s357_s22 = scalar_lea.vmem %s27_s19, 64  ;;  %p362_p1 = scmp.lt.s32.totalorder %s27_s19, %s27_s19 }
   0x6   :  { %p358_p0 = scmp.ne.s32.totalorder %s27_s19, %s357_s22  ;;  %p363_p2 = scmp.lt.s32.totalorder %s357_s22, %s357_s22 }
   0x8   :  { %p364_p3 = por %p363_p2, %p362_p1 }
   0xa   :  { %p365_p4 = pnand %p364_p3, %p358_p0 }
   0xc   :  { %368 = shalt.err (!%p365_p4)
}
   0xd   :  { %29 = dma.hbm_to_vmem [thread:$0]  %s499_s0, 64, %s27_s19, [#allocation3]  }
   0xe   :  { %s377_s25 = scalar_lea.vmem %s53_s21, 64  ;;  %p382_p6 = scmp.lt.s32.totalorder %s53_s21, %s53_s21 }
   0xf   :  { %p378_p5 = scmp.ne.s32.totalorder %s53_s21, %s377_s25  ;;  %p383_p7 = scmp.lt.s32.totalorder %s377_s25, %s377_s25 }
  0x11   :  { %p384_p8 = por %p383_p7, %p382_p6 }
  0x13   :  { %p385_p9 = pnand %p384_p8, %p378_p5 }
  0x15   :  { %388 = shalt.err (!%p385_p9)
}
  0x16   :  { %55 = dma.hbm_to_vmem [thread:$0]  %s501_s2, 64, %s53_s21, [#allocation6]  }
  0x17   :  { %429 = dma.done.wait [#allocation3], 64  }
  0x18   :  { %430 = vsyncadd [#allocation3], 4294967232 }
  0x19   :  { %431 = dma.done.wait [#allocation6], 64  }
  0x1a   :  { %432 = vsyncadd [#allocation6], 4294967232  ;;  %v439_v0 = vmov 0.0   ;;  %v145_v1 = vld [vmem:[#allocation5] sm:$0xf]  ;;  %vm161_vm0 = vcmask 1043456  }
  0x1b   :  { %113 = vst [vmem:[#allocation7] sm:$0x1] %v439_v0  ;;  %114 = vst [vmem:[#allocation8] sm:$0x1] %v439_v0  ;;  %v146_v2 = vld [vmem:[%s502_s3] sm:$0x1] }
  0x1c   :  { %115 = vst [vmem:[#allocation8 + $0x1] sm:$0x1] %v439_v0  ;;  %116 = vst [vmem:[#allocation8 + $0x2] sm:$0x1] %v439_v0  ;;  %v124_v3 = vld [vmem:[#allocation2] sm:$0xf]  ;;  %v147_v4 = vunpack.c.0.s8 %v146_v2 }
  0x1d   :  { %v152_v5 = vsub.f32 1.0, %v145_v1  ;;  %v151_v6 = vadd.f32 1e-08, %v145_v1  ;;  %v131_v7 = vand.u32 2147483647, %v124_v3  ;;  %v128_v44 = vmax.f32 %v124_v3, 0.0 }
  0x1e   :  { %v148_v8 = vcvt.s32.f32 %v147_v4  ;;  %v125_v26 = vld [vmem:[%s500_s1] sm:$0x1]  ;;  %s440_s1 = smov [#allocation8]  }
  0x1f   :  { %v153_v9 = vadd.f32 1e-08, %v152_v5  ;;  %v132_v10 = vsub.f32 0.0, %v131_v7  ;;  %v126_v31 = vunpack.c.0.s8 %v125_v26  ;;  %s309_s29 = sshll.u32 %s440_s1, 4  ;;  %s310_s29 = int_to_ptr.vmem [resolvable:$true] %s309_s29 }
  0x20   :  { %vm149_vm1 = vcmp.gt.f32.partialorder %v148_v8, 0.0  ;;  %vm150_vm2 = vcmp.eq.f32.partialorder %v148_v8, 0.0  ;;  %s389_s30 = scalar_lea.vmem %s310_s29, 48  ;;  %s393_s6 = scalar_lea.vmem %s310_s29, 64 }
  0x21   :  { %v154_v11 = vsel %vm149_vm1, %v151_v6, %v153_v9  ;;  %v159_v12 = vsel %vm149_vm1, 1.0, %v439_v0  ;;  %v133_v13 = vmul.f32 1.442695, %v132_v10  ;;  %v127_v38 = vcvt.s32.f32 %v126_v31  ;;  %p390_p10 = scmp.ne.s32.totalorder %s310_s29, %s389_s30  ;;  %p394_p11 = scmp.lt.s32.totalorder %s310_s29, %s310_s29 }
  0x22   :  { %343 = vlog2.f32 %v154_v11  ;;  %v194_v14 = vsel %vm161_vm0, %v159_v12, 0.0  ;;  %v171_v48 = vld [vmem:[#allocation8] sm:$0x1]  ;;  %p395_p12 = scmp.lt.s32.totalorder %s393_s6, %s389_s30 }
  0x23   :  { %345 = vpow2.f32 %v133_v13  ;;  %v195_v15 = vrot.slane %v194_v14, 4  ;;  %v193_v20 = vld [vmem:[#allocation8 + $0x2] sm:$0x1]  ;;  %v129_v45 = vmul.f32 %v127_v38, %v124_v3  ;;  %v182_v51 = vld [vmem:[#allocation8 + $0x1] sm:$0x1] }
  0x24   :  { %p396_p13 = por %p395_p12, %p394_p11 }
  0x25   :  { %v196_v16 = vadd.f32 %v195_v15, %v194_v14  ;;  %v130_v55 = vsub.f32 %v128_v44, %v129_v45 }
  0x26   :  { %p397_p0 = pnand %p396_p13, %p390_p10 }
  0x27   :  { %v197_v17 = vrot.slane %v196_v16, 2 }
  0x29   :  { %v198_v18 = vadd.f32 %v197_v17, %v196_v16 }
  0x2b   :  { %v199_v19 = vrot.slane %v198_v18, 1 }
  0x2d   :  { %v200_v21 = vadd.f32 %v199_v19, %v198_v18 }
  0x2f   :  { %v344_v22 = vpop.eup %343  ;;  %v201_v23 = vadd.f32 %v200_v21, %v193_v20 }
  0x30   :  { %v346_v24 = vpop.eup %345  ;;  %v156_v25 = vmul.f32 0.6931472, %v344_v22 }
  0x31   :  { %v135_v27 = vadd.f32 1.0, %v346_v24  ;;  %202 = vst [vmem:[#allocation8 + $0x2] sm:$0x1] %v201_v23  ;;  %v138_v36 = vmul.f32 -0.5, %v346_v24  ;;  %v141_v46 = vand.u32 2147483647, %v346_v24 }
  0x32   :  { %v157_v28 = vsel %vm149_vm1, %v156_v25, 0.0  ;;  %v158_v29 = vsel %vm150_vm2, %v156_v25, 0.0 }
  0x33   :  { %347 = vlog2.f32 %v135_v27  ;;  %v172_v30 = vsel %vm161_vm0, %v157_v28, 0.0  ;;  %v183_v33 = vsel %vm161_vm0, %v158_v29, 0.0  ;;  %v139_v42 = vadd.f32 1.0, %v138_v36 }
  0x34   :  { %v173_v32 = vrot.slane %v172_v30, 4  ;;  %v184_v34 = vrot.slane %v183_v33, 4  ;;  %vm142_vm3 = vcmp.lt.f32.partialorder %v141_v46, 0.0004427343 }
  0x35   :  { %v140_v52 = vmul.f32 %v346_v24, %v139_v42 }
  0x36   :  { %v174_v35 = vadd.f32 %v173_v32, %v172_v30  ;;  %v185_v37 = vadd.f32 %v184_v34, %v183_v33 }
  0x38   :  { %v175_v39 = vrot.slane %v174_v35, 2  ;;  %v186_v40 = vrot.slane %v185_v37, 2 }
  0x3a   :  { %v176_v41 = vadd.f32 %v175_v39, %v174_v35  ;;  %v187_v43 = vadd.f32 %v186_v40, %v185_v37 }
  0x3c   :  { %v177_v47 = vrot.slane %v176_v41, 1  ;;  %v188_v49 = vrot.slane %v187_v43, 1 }
  0x3e   :  { %v178_v50 = vadd.f32 %v177_v47, %v176_v41  ;;  %v189_v53 = vadd.f32 %v188_v49, %v187_v43 }
  0x40   :  { %v348_v54 = vpop.eup %347  ;;  %v179_v56 = vadd.f32 %v178_v50, %v171_v48  ;;  %v190_v58 = vadd.f32 %v189_v53, %v182_v51 }
  0x41   :  { %v137_v57 = vmul.f32 0.6931472, %v348_v54 }
  0x42   :  { %180 = vst [vmem:[#allocation8] sm:$0x1] %v179_v56  ;;  %191 = vst [vmem:[#allocation8 + $0x1] sm:$0x1] %v190_v58 }
  0x43   :  { %v143_v59 = vsel %vm142_vm3, %v140_v52, %v137_v57 }
  0x44   :  { %v144_v60 = vadd.f32 %v143_v59, %v130_v55 }
  0x45   :  { %400 = shalt.err (!%p397_p0)
}
  0x46   :  { %s441_s7 = smov 16   ;;  %s442_s8 = smov 1   ;;  %v162_v61 = vsel %vm161_vm0, %v144_v60, 0.0  ;;  %v160_v3 = vld [vmem:[#allocation7] sm:$0x1] }
  0x47   :  { %315 = dma.vmem_to_hbm [thread:$0]  %s310_s29, 48, %s504_s5, [#allocation9], %s441_s7, %s441_s7, %s442_s8   ;;  %v163_v62 = vrot.slane %v162_v61, 4 }
  0x48   :  { %s443_s11 = smov [#allocation7]  }
  0x49   :  { %v164_v63 = vadd.f32 %v163_v62, %v162_v61  ;;  %s300_s12 = sshll.u32 %s443_s11, 4  ;;  %s301_s12 = int_to_ptr.vmem [resolvable:$true] %s300_s12 }
  0x4a   :  { %s409_s13 = scalar_lea.vmem %s301_s12, 16  ;;  %s413_s14 = scalar_lea.vmem %s301_s12, 32 }
  0x4b   :  { %v165_v0 = vrot.slane %v164_v63, 2  ;;  %p410_p1 = scmp.ne.s32.totalorder %s301_s12, %s409_s13  ;;  %p414_p2 = scmp.lt.s32.totalorder %s301_s12, %s301_s12 }
  0x4c   :  { %p415_p3 = scmp.lt.s32.totalorder %s413_s14, %s409_s13 }
  0x4d   :  { %v166_v1 = vadd.f32 %v165_v0, %v164_v63 }
  0x4e   :  { %p416_p4 = por %p415_p3, %p414_p2 }
  0x4f   :  { %v167_v2 = vrot.slane %v166_v1, 1 }
  0x50   :  { %p417_p5 = pnand %p416_p4, %p410_p1 }
  0x51   :  { %v168_v4 = vadd.f32 %v167_v2, %v166_v1 }
  0x53   :  { %v169_v5 = vadd.f32 %v168_v4, %v160_v3 }
  0x55   :  { %170 = vst [vmem:[#allocation7] sm:$0x1] %v169_v5 }
  0x56   :  { %420 = shalt.err (!%p417_p5)
}
  0x57   :  { %303 = dma.vmem_to_hbm [thread:$0]  %s301_s12, 16, %s503_s4, [#allocation4]  }
  0x58   :  { %433 = dma.done.wait [#allocation4], 16  }
  0x59   :  { %434 = vsyncadd [#allocation4], 4294967280 }
  0x5a   :  { %435 = dma.done.wait [#allocation9], 48  }
  0x5b   :  { %436 = vsyncadd [#allocation9], 4294967248 }
  0x5c   :  { %322 = vsyncpa [#allocation3], 1 }
  0x5d   :  { %323 = vsyncpa [#allocation6], 1 }
  0x5e   :  { %324 = vsyncpa [#allocation4], 1 }
  0x5f   :  { %325 = vsyncpa [#allocation9], 1 }

</bundles_post_ra>
